<compile_context>
chip_gen: v7x
topology: tpu7x:2x2x1
jax: 0.10.0
libtpu: 0.0.40
codegen_flags: <defaults>
</compile_context>

<pallas_src>
import functools
import math

import jax
import jax.numpy as jnp
from jax.experimental import pallas as pl
from jax.experimental.pallas import tpu as pltpu


def _silu(z):
    # f32 SiLU; the exp lands on the (otherwise idle) EUP slot.
    return z * (1.0 / (1.0 + jnp.exp(-z)))


# ----------------------------- parameter packing -----------------------------

def _block_diag3(w):
    """3-fold block-diagonal embedding of w: (r, c) -> (3r, 3c)."""
    r, c = w.shape
    out = jnp.zeros((3 * r, 3 * c), jnp.float32)
    for k in range(3):
        out = out.at[k * r:(k + 1) * r, k * c:(k + 1) * c].set(w)
    return out


def _prep_params(block1_params, block2_params, hidden):
    """Fold/transpose PyTorch-convention weights and pack into one f32 slab.

    block*_params = (w_vec1, w_vec2, w_u0, b_u0, w_u2, b_u2) with nn.Linear
    convention W: (out_features, in_features), y = x @ W.T + b.
    The cat([x, vec1]) input and split(..., out_channels) output of update_net
    are folded into split weight matrices; vec1_proj / vec2_proj become 3-fold
    block-diagonal so the kernel keeps v lane-grouped as (N, 3H).  Block 2's
    vector branch is dead in EquivariantScalar and is not packed.

    Returns (slab, layout) with layout[name] = (row_offset, rows, cols).
    """
    entries = []

    def add(name, m):
        entries.append((name, jnp.asarray(m, jnp.float32)))

    def prep_block(params, cin, cout, tag, last):
        w_vec1, w_vec2, w_u0, b_u0, w_u2, b_u2 = params
        add(f"w_vec1_bd{tag}", _block_diag3(jnp.asarray(w_vec1, jnp.float32).T))
        if not last:
            add(f"w_vec2_bd{tag}", _block_diag3(jnp.asarray(w_vec2, jnp.float32).T))
        w_u0_t = jnp.asarray(w_u0, jnp.float32).T            # (2*cin, inter)
        add(f"w_u0x{tag}", w_u0_t[:cin])                     # multiplies x
        add(f"w_u0v{tag}", w_u0_t[cin:])                     # multiplies vec1
        add(f"b_u0{tag}", jnp.asarray(b_u0, jnp.float32).reshape(1, -1))
        w_u2_t = jnp.asarray(w_u2, jnp.float32).T            # (inter, 2*cout)
        b_u2 = jnp.asarray(b_u2, jnp.float32)
        add(f"w_u2x{tag}", w_u2_t[:, :cout])                 # scalar branch
        add(f"b_u2x{tag}", b_u2[:cout].reshape(1, -1))
        if not last:
            add(f"w_u2g{tag}", w_u2_t[:, cout:])             # vector-gate branch
            add(f"b_u2g{tag}", b_u2[cout:].reshape(1, -1))

    half = hidden // 2
    prep_block(block1_params, hidden, half, 1, last=False)
    prep_block(block2_params, half, 1, 2, last=True)

    width = 3 * hidden
    layout, blocks, off = {}, [], 0
    for name, m in entries:
        r, c = m.shape
        rp = ((r + 7) // 8) * 8                              # sublane (8-row) align
        blocks.append(jnp.zeros((rp, width), jnp.float32).at[:r, :c].set(m))
        layout[name] = (off, r, c)
        off += rp
    return jnp.concatenate(blocks, axis=0), layout


# ----------------------------------- kernel ----------------------------------

def _equivariant_scalar_kernel(x_ref, vg_ref, p_ref, o_ref, *, layout, hidden):
    f32 = jnp.float32
    H = hidden
    C = hidden // 2

    def param(name):
        r0, r, c = layout[name]
        return p_ref[r0:r0 + r, 0:c]          # static slice of the packed slab

    def dot(a, b):
        return jnp.dot(a, b, preferred_element_type=f32)

    x = x_ref[...].astype(f32)                 # (tn, H)
    vg = vg_ref[...].astype(f32)               # (tn, 3H); lane groups = spatial x|y|z

    # ---- Block 1: GatedEquivariantBlock(H, H//2, scalar_activation=True) ----
    v1p = dot(vg, param("w_vec1_bd1"))         # (tn, 3H)  vec1_proj per spatial comp
    vec2 = dot(vg, param("w_vec2_bd1"))        # (tn, 3C)  vec2_proj per spatial comp
    s = v1p * v1p
    vec1 = jnp.sqrt(s[:, 0:H] + s[:, H:2 * H] + s[:, 2 * H:3 * H])   # norm over spatial axis
    h = _silu(dot(x, param("w_u0x1")) + dot(vec1, param("w_u0v1")) + param("b_u01"))
    x1 = _silu(dot(h, param("w_u2x1")) + param("b_u2x1"))            # scalar branch (+SiLU)
    gate = dot(h, param("w_u2g1")) + param("b_u2g1")                 # vector gate (no act)
    vg2 = jnp.concatenate([gate, gate, gate], axis=-1) * vec2        # (tn, 3C) gated vectors

    # ---- Block 2: GatedEquivariantBlock(H//2, 1); vector branch is dead ----
    p2 = dot(vg2, param("w_vec1_bd2"))         # (tn, 3C)
    s2 = p2 * p2
    vec1b = jnp.sqrt(s2[:, 0:C] + s2[:, C:2 * C] + s2[:, 2 * C:3 * C])
    h2 = _silu(dot(x1, param("w_u0x2")) + dot(vec1b, param("w_u0v2")) + param("b_u02"))
    out = dot(h2, param("w_u2x2")) + param("b_u2x2")                 # (tn, 1), no scalar act

    # EquivariantScalar.forward returns x + v.sum() * 0 == x.
    o_ref[...] = out.astype(o_ref.dtype)


# ---------------------------------- wrapper -----------------------------------

def _cost_estimate(n, hidden, x_bytes, v_bytes, param_bytes):
    H, C = hidden, hidden // 2
    flops_per_row = (
        2 * 3 * H * 3 * H          # vec1_proj (block-diag)
        + 2 * 3 * H * 3 * C        # vec2_proj (block-diag)
        + 2 * 2 * H * H            # update_net[0] (two folded matmuls), inter = H
        + 2 * 2 * H * C            # update_net[2] scalar + gate
        + 2 * 3 * C * 3 * C        # block-2 vec1_proj (block-diag)
        + 2 * 2 * C * C            # block-2 update_net[0], inter = C
        + 2 * C                    # block-2 update_net[2], scalar only
    )
    transcendentals = n * (2 * H + 3 * C)      # sigmoids + sqrts
    bytes_accessed = n * H * x_bytes + n * 3 * H * v_bytes + n * 4 + param_bytes
    return pl.CostEstimate(flops=n * flops_per_row,
                           transcendentals=transcendentals,
                           bytes_accessed=bytes_accessed)


def _choose_tile_n(n):
    n8 = -(-n // 8) * 8
    # One tile for small inputs; cap at 1024 rows so the per-tile footprint
    # stays ~1 MiB double-buffered (safe on v7x's 64 MiB VMEM) and large N gets
    # >= 2 grid steps so both v7x TensorCores are used via "parallel" semantics.
    return n8 if n8 <= 1024 else 1024


def equivariant_scalar(x, v, block1_params, block2_params, *, tile_n=None):
    """Forward pass of EquivariantScalar.

    x : (N, H) scalar features; v : (N, 3, H) vector features (f32 or bf16).
    Parameters use the PyTorch nn.Linear convention.  Returns (N, 1).
    """
    n, hidden = x.shape
    assert v.shape == (n, 3, hidden), v.shape

    slab, layout = _prep_params(block1_params, block2_params, hidden)

    # Free, layout-preserving merge of the trailing dims (NOT a transpose; no
    # extra HBM pass): lane groups [0:H], [H:2H], [2H:3H] = spatial x/y/z.
    vg = v.reshape(n, 3 * hidden)

    n8 = -(-n // 8) * 8
    if tile_n is None:
        tile_n = _choose_tile_n(n)
    tile_n = min(-(-tile_n // 8) * 8, n8)
    grid = (pl.cdiv(n, tile_n),)

    kernel = functools.partial(_equivariant_scalar_kernel,
                               layout=layout, hidden=hidden)

    x_bytes = jnp.dtype(x.dtype).itemsize
    v_bytes = jnp.dtype(v.dtype).itemsize
    param_bytes = int(slab.size) * 4

    return pl.pallas_call(
        kernel,
        out_shape=jax.ShapeDtypeStruct((n, 1), x.dtype),
        grid_spec=pltpu.PrefetchScalarGridSpec(
            num_scalar_prefetch=0,
            grid=grid,
            in_specs=[
                pl.BlockSpec((tile_n, hidden), lambda i: (i, 0)),       # x
                pl.BlockSpec((tile_n, 3 * hidden), lambda i: (i, 0)),   # v (lane-grouped)
                pl.BlockSpec(slab.shape, lambda i: (0, 0)),             # packed params (fetched once)
            ],
            out_specs=pl.BlockSpec((tile_n, 1), lambda i: (i, 0)),
        ),
        compiler_params=pltpu.CompilerParams(
            dimension_semantics=("parallel",),
            vmem_limit_bytes=32 * 1024 * 1024,
        ),
        cost_estimate=_cost_estimate(n, hidden, x_bytes, v_bytes, param_bytes),
    )(x, vg, slab)


# ----------------------------- reference & test -------------------------------

def _reference_equivariant_scalar(x, v, block1_params, block2_params):
    def geb(x, v, params, out_channels, scalar_activation):
        w_vec1, w_vec2, w_u0, b_u0, w_u2, b_u2 = params
        vec1 = jnp.linalg.norm(v @ w_vec1.T, axis=-2)              # (N, cin)
        vec2 = v @ w_vec2.T                                        # (N, 3, cout)
        h = jax.nn.silu(jnp.concatenate([x, vec1], axis=-1) @ w_u0.T + b_u0)
        u = h @ w_u2.T + b_u2
        x_new, gate = u[:, :out_channels], u[:, out_channels:]
        v_new = gate[:, None, :] * vec2
        if scalar_activation:
            x_new = jax.nn.silu(x_new)
        return x_new, v_new

    hidden = x.shape[1]
    x, v = geb(x, v, block1_params, hidden // 2, True)
    x, v = geb(x, v, block2_params, 1, False)
    return x + jnp.sum(v) * 0.0


def _xavier_uniform(key, out_features, in_features, dtype=jnp.float32):
    bound = math.sqrt(6.0 / (in_features + out_features))
    return jax.random.uniform(key, (out_features, in_features),
                              minval=-bound, maxval=bound, dtype=dtype)


def _init_block(key, cin, cout, inter=None):
    if inter is None:
        inter = cin
    k1, k2, k3, k4, k5, k6 = jax.random.split(key, 6)
    w_vec1 = _xavier_uniform(k1, cin, cin)           # vec1_proj (bias=False)
    w_vec2 = _xavier_uniform(k2, cout, cin)          # vec2_proj (bias=False)
    w_u0 = _xavier_uniform(k3, inter, 2 * cin)       # update_net[0]
    w_u2 = _xavier_uniform(k4, 2 * cout, inter)      # update_net[2]
    # reset_parameters() zeroes the biases; nonzero values here exercise the
    # bias-split path in the kernel.
    b_u0 = 0.1 * jax.random.normal(k5, (inter,), jnp.float32)
    b_u2 = 0.1 * jax.random.normal(k6, (2 * cout,), jnp.float32)
    return (w_vec1, w_vec2, w_u0, b_u0, w_u2, b_u2)


if __name__ == "__main__":
    N, HIDDEN = 8, 32                                # atoms, hidden_channels

    key = jax.random.PRNGKey(0)
    kx, kv, kb1, kb2 = jax.random.split(key, 4)
    x = jax.random.normal(kx, (N, HIDDEN), jnp.float32)
    v = jax.random.normal(kv, (N, 3, HIDDEN), jnp.float32)

    # GatedEquivariantBlock(H, H//2, scalar_activation=True), then (H//2, 1)
    block1 = _init_block(kb1, HIDDEN, HIDDEN // 2)
    block2 = _init_block(kb2, HIDDEN // 2, 1)

    fwd = jax.jit(lambda xx, vv: equivariant_scalar(xx, vv, block1, block2))

    # f32 path: tight check against the f32 reference.
    out = jax.block_until_ready(fwd(x, v))
    ref = _reference_equivariant_scalar(x, v, block1, block2)
    assert out.shape == (N, 1), out.shape
    assert jnp.allclose(out, ref, atol=1e-5, rtol=1e-5), (
        f"max abs err {jnp.max(jnp.abs(out - ref))}")

    # bf16 streaming path: producer hands x/v in bf16 at the HBM boundary;
    # kernel computes in f32.  Compare against the reference fed the same
    # bf16-quantized inputs (looser: the output itself is stored as bf16).
    x16, v16 = x.astype(jnp.bfloat16), v.astype(jnp.bfloat16)
    out16 = jax.block_until_ready(fwd(x16, v16))
    ref16 = _reference_equivariant_scalar(
        x16.astype(jnp.float32), v16.astype(jnp.float32), block1, block2)
    assert jnp.allclose(out16.astype(jnp.float32), ref16, atol=1e-2, rtol=1e-2), (
        f"bf16 max abs err {jnp.max(jnp.abs(out16.astype(jnp.float32) - ref16))}")

    print("KERNEL_OK")
</pallas_src>

<mosaic_0001>
module attributes {stable_mosaic.version = 11 : i64} {
  func.func @_equivariant_scalar_kernel(%arg0: i32, %arg1: memref<8x32xf32, #tpu.memory_space<vmem>>, %arg2: memref<8x96xf32, #tpu.memory_space<vmem>>, %arg3: memref<456x96xf32, #tpu.memory_space<vmem>>, %arg4: memref<8x1xf32, #tpu.memory_space<vmem>>) attributes {dimension_semantics = [#tpu.dimension_semantics<parallel>], iteration_bounds = array<i64: 1>, scalar_prefetch = 0 : i64, scratch_operands = 0 : i64, tpu.core_type = #tpu.core_type<tc>, window_params = [{transform_indices = @transform_0, window_bounds = array<i64: 8, 32>}, {transform_indices = @transform_1, window_bounds = array<i64: 8, 96>}, {pipeline_mode = #tpu.pipeline_mode<synchronous>, transform_indices = @transform_2, window_bounds = array<i64: 456, 96>}, {transform_indices = @transform_3, window_bounds = array<i64: 8, 1>}]} {
    %c0 = arith.constant 0 : index
    %c0_0 = arith.constant 0 : index
    %0 = vector.load %arg1[%c0, %c0_0] : memref<8x32xf32, #tpu.memory_space<vmem>>, vector<8x32xf32>
    %c0_1 = arith.constant 0 : index
    %c0_2 = arith.constant 0 : index
    %1 = vector.load %arg2[%c0_1, %c0_2] : memref<8x96xf32, #tpu.memory_space<vmem>>, vector<8x96xf32>
    %c0_3 = arith.constant 0 : index
    %c0_4 = arith.constant 0 : index
    %2 = vector.load %arg3[%c0_3, %c0_4] : memref<456x96xf32, #tpu.memory_space<vmem>>, vector<96x96xf32>
    %cst = arith.constant dense<0.000000e+00> : vector<8x96xf32>
    %3 = tpu.matmul %1, %2, %cst {dimension_numbers = #tpu.dot_dimension_numbers<[1], [0], [0], [1], [0, 0, 1, 1], [], []>} : vector<8x96xf32>, vector<96x96xf32>, vector<8x96xf32> -> vector<8x96xf32>
    %c96 = arith.constant 96 : index
    %c0_5 = arith.constant 0 : index
    %4 = vector.load %arg3[%c96, %c0_5] : memref<456x96xf32, #tpu.memory_space<vmem>>, vector<96x48xf32>
    %cst_6 = arith.constant dense<0.000000e+00> : vector<8x48xf32>
    %5 = tpu.matmul %1, %4, %cst_6 {dimension_numbers = #tpu.dot_dimension_numbers<[1], [0], [0], [1], [0, 0, 1, 1], [], []>} : vector<8x96xf32>, vector<96x48xf32>, vector<8x48xf32> -> vector<8x48xf32>
    %6 = arith.mulf %3, %3 : vector<8x96xf32>
    %7 = vector.extract_strided_slice %6 {offsets = [0, 0], sizes = [8, 32], strides = [1, 1]} : vector<8x96xf32> to vector<8x32xf32>
    %8 = vector.extract_strided_slice %6 {offsets = [0, 32], sizes = [8, 32], strides = [1, 1]} : vector<8x96xf32> to vector<8x32xf32>
    %9 = arith.addf %7, %8 : vector<8x32xf32>
    %10 = vector.extract_strided_slice %6 {offsets = [0, 64], sizes = [8, 32], strides = [1, 1]} : vector<8x96xf32> to vector<8x32xf32>
    %11 = arith.addf %9, %10 : vector<8x32xf32>
    %12 = math.sqrt %11 : vector<8x32xf32>
    %c192 = arith.constant 192 : index
    %c0_7 = arith.constant 0 : index
    %13 = vector.load %arg3[%c192, %c0_7] : memref<456x96xf32, #tpu.memory_space<vmem>>, vector<32x32xf32>
    %cst_8 = arith.constant dense<0.000000e+00> : vector<8x32xf32>
    %14 = tpu.matmul %0, %13, %cst_8 {dimension_numbers = #tpu.dot_dimension_numbers<[1], [0], [0], [1], [0, 0, 1, 1], [], []>} : vector<8x32xf32>, vector<32x32xf32>, vector<8x32xf32> -> vector<8x32xf32>
    %c224 = arith.constant 224 : index
    %c0_9 = arith.constant 0 : index
    %15 = vector.load %arg3[%c224, %c0_9] : memref<456x96xf32, #tpu.memory_space<vmem>>, vector<32x32xf32>
    %cst_10 = arith.constant dense<0.000000e+00> : vector<8x32xf32>
    %16 = tpu.matmul %12, %15, %cst_10 {dimension_numbers = #tpu.dot_dimension_numbers<[1], [0], [0], [1], [0, 0, 1, 1], [], []>} : vector<8x32xf32>, vector<32x32xf32>, vector<8x32xf32> -> vector<8x32xf32>
    %17 = arith.addf %14, %16 : vector<8x32xf32>
    %c256 = arith.constant 256 : index
    %c0_11 = arith.constant 0 : index
    %18 = vector.load %arg3[%c256, %c0_11] : memref<456x96xf32, #tpu.memory_space<vmem>>, vector<1x32xf32>
    %19 = vector.broadcast %18 : vector<1x32xf32> to vector<8x32xf32>
    %20 = arith.addf %17, %19 : vector<8x32xf32>
    %cst_12 = arith.constant 0.000000e+00 : f32
    %21 = vector.broadcast %cst_12 : f32 to vector<8x32xf32>
    %22 = arith.subf %21, %20 : vector<8x32xf32>
    %23 = math.exp %22 : vector<8x32xf32>
    %cst_13 = arith.constant 1.000000e+00 : f32
    %24 = vector.broadcast %cst_13 : f32 to vector<8x32xf32>
    %25 = arith.addf %24, %23 : vector<8x32xf32>
    %cst_14 = arith.constant 1.000000e+00 : f32
    %26 = vector.broadcast %cst_14 : f32 to vector<8x32xf32>
    %27 = arith.divf %26, %25 : vector<8x32xf32>
    %28 = arith.mulf %20, %27 : vector<8x32xf32>
    %c264 = arith.constant 264 : index
    %c0_15 = arith.constant 0 : index
    %29 = vector.load %arg3[%c264, %c0_15] : memref<456x96xf32, #tpu.memory_space<vmem>>, vector<32x16xf32>
    %cst_16 = arith.constant dense<0.000000e+00> : vector<8x16xf32>
    %30 = tpu.matmul %28, %29, %cst_16 {dimension_numbers = #tpu.dot_dimension_numbers<[1], [0], [0], [1], [0, 0, 1, 1], [], []>} : vector<8x32xf32>, vector<32x16xf32>, vector<8x16xf32> -> vector<8x16xf32>
    %c296 = arith.constant 296 : index
    %c0_17 = arith.constant 0 : index
    %31 = vector.load %arg3[%c296, %c0_17] : memref<456x96xf32, #tpu.memory_space<vmem>>, vector<1x16xf32>
    %32 = vector.broadcast %31 : vector<1x16xf32> to vector<8x16xf32>
    %33 = arith.addf %30, %32 : vector<8x16xf32>
    %cst_18 = arith.constant 0.000000e+00 : f32
    %34 = vector.broadcast %cst_18 : f32 to vector<8x16xf32>
    %35 = arith.subf %34, %33 : vector<8x16xf32>
    %36 = math.exp %35 : vector<8x16xf32>
    %cst_19 = arith.constant 1.000000e+00 : f32
    %37 = vector.broadcast %cst_19 : f32 to vector<8x16xf32>
    %38 = arith.addf %37, %36 : vector<8x16xf32>
    %cst_20 = arith.constant 1.000000e+00 : f32
    %39 = vector.broadcast %cst_20 : f32 to vector<8x16xf32>
    %40 = arith.divf %39, %38 : vector<8x16xf32>
    %41 = arith.mulf %33, %40 : vector<8x16xf32>
    %c304 = arith.constant 304 : index
    %c0_21 = arith.constant 0 : index
    %42 = vector.load %arg3[%c304, %c0_21] : memref<456x96xf32, #tpu.memory_space<vmem>>, vector<32x16xf32>
    %cst_22 = arith.constant dense<0.000000e+00> : vector<8x16xf32>
    %43 = tpu.matmul %28, %42, %cst_22 {dimension_numbers = #tpu.dot_dimension_numbers<[1], [0], [0], [1], [0, 0, 1, 1], [], []>} : vector<8x32xf32>, vector<32x16xf32>, vector<8x16xf32> -> vector<8x16xf32>
    %c336 = arith.constant 336 : index
    %c0_23 = arith.constant 0 : index
    %44 = vector.load %arg3[%c336, %c0_23] : memref<456x96xf32, #tpu.memory_space<vmem>>, vector<1x16xf32>
    %45 = vector.broadcast %44 : vector<1x16xf32> to vector<8x16xf32>
    %46 = arith.addf %43, %45 : vector<8x16xf32>
    %47 = tpu.concatenate %46, %46, %46 in 1 : vector<8x16xf32>, vector<8x16xf32>, vector<8x16xf32> -> vector<8x48xf32>
    %48 = arith.mulf %47, %5 : vector<8x48xf32>
    %c344 = arith.constant 344 : index
    %c0_24 = arith.constant 0 : index
    %49 = vector.load %arg3[%c344, %c0_24] : memref<456x96xf32, #tpu.memory_space<vmem>>, vector<48x48xf32>
    %cst_25 = arith.constant dense<0.000000e+00> : vector<8x48xf32>
    %50 = tpu.matmul %48, %49, %cst_25 {dimension_numbers = #tpu.dot_dimension_numbers<[1], [0], [0], [1], [0, 0, 1, 1], [], []>} : vector<8x48xf32>, vector<48x48xf32>, vector<8x48xf32> -> vector<8x48xf32>
    %51 = arith.mulf %50, %50 : vector<8x48xf32>
    %52 = vector.extract_strided_slice %51 {offsets = [0, 0], sizes = [8, 16], strides = [1, 1]} : vector<8x48xf32> to vector<8x16xf32>
    %53 = vector.extract_strided_slice %51 {offsets = [0, 16], sizes = [8, 16], strides = [1, 1]} : vector<8x48xf32> to vector<8x16xf32>
    %54 = arith.addf %52, %53 : vector<8x16xf32>
    %55 = vector.extract_strided_slice %51 {offsets = [0, 32], sizes = [8, 16], strides = [1, 1]} : vector<8x48xf32> to vector<8x16xf32>
    %56 = arith.addf %54, %55 : vector<8x16xf32>
    %57 = math.sqrt %56 : vector<8x16xf32>
    %c392 = arith.constant 392 : index
    %c0_26 = arith.constant 0 : index
    %58 = vector.load %arg3[%c392, %c0_26] : memref<456x96xf32, #tpu.memory_space<vmem>>, vector<16x16xf32>
    %cst_27 = arith.constant dense<0.000000e+00> : vector<8x16xf32>
    %59 = tpu.matmul %41, %58, %cst_27 {dimension_numbers = #tpu.dot_dimension_numbers<[1], [0], [0], [1], [0, 0, 1, 1], [], []>} : vector<8x16xf32>, vector<16x16xf32>, vector<8x16xf32> -> vector<8x16xf32>
    %c408 = arith.constant 408 : index
    %c0_28 = arith.constant 0 : index
    %60 = vector.load %arg3[%c408, %c0_28] : memref<456x96xf32, #tpu.memory_space<vmem>>, vector<16x16xf32>
    %cst_29 = arith.constant dense<0.000000e+00> : vector<8x16xf32>
    %61 = tpu.matmul %57, %60, %cst_29 {dimension_numbers = #tpu.dot_dimension_numbers<[1], [0], [0], [1], [0, 0, 1, 1], [], []>} : vector<8x16xf32>, vector<16x16xf32>, vector<8x16xf32> -> vector<8x16xf32>
    %62 = arith.addf %59, %61 : vector<8x16xf32>
    %c424 = arith.constant 424 : index
    %c0_30 = arith.constant 0 : index
    %63 = vector.load %arg3[%c424, %c0_30] : memref<456x96xf32, #tpu.memory_space<vmem>>, vector<1x16xf32>
    %64 = vector.broadcast %63 : vector<1x16xf32> to vector<8x16xf32>
    %65 = arith.addf %62, %64 : vector<8x16xf32>
    %cst_31 = arith.constant 0.000000e+00 : f32
    %66 = vector.broadcast %cst_31 : f32 to vector<8x16xf32>
    %67 = arith.subf %66, %65 : vector<8x16xf32>
    %68 = math.exp %67 : vector<8x16xf32>
    %cst_32 = arith.constant 1.000000e+00 : f32
    %69 = vector.broadcast %cst_32 : f32 to vector<8x16xf32>
    %70 = arith.addf %69, %68 : vector<8x16xf32>
    %cst_33 = arith.constant 1.000000e+00 : f32
    %71 = vector.broadcast %cst_33 : f32 to vector<8x16xf32>
    %72 = arith.divf %71, %70 : vector<8x16xf32>
    %73 = arith.mulf %65, %72 : vector<8x16xf32>
    %c432 = arith.constant 432 : index
    %c0_34 = arith.constant 0 : index
    %74 = vector.load %arg3[%c432, %c0_34] : memref<456x96xf32, #tpu.memory_space<vmem>>, vector<16x1xf32>
    %cst_35 = arith.constant dense<0.000000e+00> : vector<8x1xf32>
    %75 = tpu.matmul %73, %74, %cst_35 {dimension_numbers = #tpu.dot_dimension_numbers<[1], [0], [0], [1], [0, 0, 1, 1], [], []>} : vector<8x16xf32>, vector<16x1xf32>, vector<8x1xf32> -> vector<8x1xf32>
    %c448 = arith.constant 448 : index
    %c0_36 = arith.constant 0 : index
    %76 = vector.load %arg3[%c448, %c0_36] : memref<456x96xf32, #tpu.memory_space<vmem>>, vector<1x1xf32>
    %77 = vector.broadcast %76 : vector<1x1xf32> to vector<8x1xf32>
    %78 = arith.addf %75, %77 : vector<8x1xf32>
    %c0_37 = arith.constant 0 : index
    %c0_38 = arith.constant 0 : index
    %79 = vector.load %arg4[%c0_37, %c0_38] : memref<8x1xf32, #tpu.memory_space<vmem>>, vector<8x1xf32>
    tpu.vector_store %arg4[%c0_37, %c0_38], %78 {strides = array<i32>} : memref<8x1xf32, #tpu.memory_space<vmem>>, vector<8x1xf32>,
    return
  }
  func.func @transform_0(%arg0: i32) -> (i32, i32) {
    %c0_i32 = arith.constant 0 : i32
    %c0_i32_0 = arith.constant 0 : i32
    return %arg0, %c0_i32 : i32, i32
  }
  func.func @transform_1(%arg0: i32) -> (i32, i32) {
    %c0_i32 = arith.constant 0 : i32
    %c0_i32_0 = arith.constant 0 : i32
    return %arg0, %c0_i32 : i32, i32
  }
  func.func @transform_2(%arg0: i32) -> (i32, i32) {
    %c0_i32 = arith.constant 0 : i32
    %c0_i32_0 = arith.constant 0 : i32
    %c0_i32_1 = arith.constant 0 : i32
    return %c0_i32, %c0_i32_0 : i32, i32
  }
  func.func @transform_3(%arg0: i32) -> (i32, i32) {
    %c0_i32 = arith.constant 0 : i32
    %c0_i32_0 = arith.constant 0 : i32
    return %arg0, %c0_i32 : i32, i32
  }
}

</mosaic_0001>

<bundles_post_ra>
// kernel: _lambda_.1
= control target key start
LH: loop header
LB: loop body
LE: loop exit
PB: predicated region body
PF: predicated region fallthrough
CT: control target
= control target key end

     0   :  { %v1207_v0 = vmov 0.0|0.0   ;;  %vm1208_vm0 = vmmov 0   ;;  %v1209_v4 = vmov 0.0   ;;  %vm28_vm1 = vcmask 785408   ;;  %s1210_s22 = smov 96   ;;  %s1211_s23 = smov 64   ;;  %s1477_s2 = inlined_call_operand.vmem [shape: f32[456,96], index: 2, kind: input, shape index: {}]   ;;  %s1478_s1 = inlined_call_operand.vmem [shape: f32[8,96], index: 1, kind: input, shape index: {}]   ;;  %s1479_s0 = inlined_call_operand.vmem [shape: f32[8,32], index: 0, kind: input, shape index: {}]   ;;  %s1480_s3 = inlined_call_operand.vmem [shape: f32[8,1], index: 3, kind: output, shape index: {}]  }
   0x1   :  { %1105 = vmatprep.subr.bf16.mxu0 %v1207_v0  ;;  %v16_v1 = vld [vmem:[%s1477_s2] sm:$0xff]  ;;  %v17_v2 = vld [vmem:[%s1477_s2 + $0x8] sm:$0xff]  ;;  %v18_v3 = vld [vmem:[%s1477_s2 + $0x10] sm:$0xff]  ;;  %995 = vmatprep.mubr.msk.f32.mxu0 %vm1208_vm0, %v1209_v4  ;;  %vm209_vm2 = vcmask 261120   ;;  %s1212_s29 = smov 16   ;;  %s1213_s30 = smov 32  }
   0x2   :  { %v1106_v5 = vpack.c.bf16 %v17_v2, %v16_v1  ;;  %v19_v6 = vld [vmem:[%s1477_s2 + $0x18] sm:$0xff]  ;;  %1123 = vmatprep.subr.bf16.mxu1 %v1207_v0  ;;  %1022 = vmatprep.mubr.msk.f32.mxu1 %vm1208_vm0, %v1209_v4  ;;  %v20_v8 = vld [vmem:[%s1477_s2 + $0x20] sm:$0xff]  ;;  %v21_v9 = vld [vmem:[%s1477_s2 + $0x28] sm:$0xff]  ;;  %vm544_vm5 = vcmask 130048   ;;  %vm554_vm6 = vcmask 392192   ;;  %s1214_s8 = smov 112  }
   0x3   :  { %v1109_v7 = vpack.c.bf16 %v19_v6, %v18_v3  ;;  %v1112_v10 = vpack.c.bf16 %v21_v9, %v20_v8  ;;  %v22_v11 = vld [vmem:[%s1477_s2 + $0x30] sm:$0xff]  ;;  %v23_v12 = vld [vmem:[%s1477_s2 + $0x38] sm:$0xff]  ;;  %v24_v14 = vld [vmem:[%s1477_s2 + $0x40] sm:$0xff]  ;;  %vm888_vm9 = vcmask 7168  }
   0x4   :  { %1107 = vmatpush3.bf16.msra.mxu0 %v1106_v5  ;;  %v1115_v13 = vpack.c.bf16 %v23_v12, %v22_v11  ;;  %v25_v15 = vld [vmem:[%s1477_s2 + $0x48] sm:$0xff]  ;;  %v26_v17 = vld [vmem:[%s1477_s2 + $0x50] sm:$0xff]  ;;  %v27_v18 = vld [vmem:[%s1477_s2 + $0x58] sm:$0xff] }
   0x5   :  { %1108 = vmatprep.subr.bf16.mxu0 %v1207_v0  ;;  %v1118_v16 = vpack.c.bf16 %v25_v15, %v24_v14  ;;  %v1121_v19 = vpack.c.bf16 %v27_v18, %v26_v17  ;;  %v15_v20 = vld [vmem:[%s1478_s1] sm:$0xff]  ;;  %v103_v22 = vld [vmem:[%s1477_s2 + $0x68] sm:$0xff]  ;;  %v104_v23 = vld [vmem:[%s1477_s2 + $0x70] sm:$0xff] }
   0x6   :  { %v102_v21 = vld [vmem:[%s1477_s2 + $0x60] sm:$0xff]  ;;  %v105_v25 = vld [vmem:[%s1477_s2 + $0x78] sm:$0xff]  ;;  %v107_v28 = vld [vmem:[%s1477_s2 + $0x88] sm:$0xff] }
   0x7   :  { %v1124_v24 = vpack.c.bf16 %v103_v22, %v102_v21  ;;  %v1127_v26 = vpack.c.bf16 %v105_v25, %v104_v23  ;;  %v106_v27 = vld [vmem:[%s1477_s2 + $0x80] sm:$0xff]  ;;  %v108_v30 = vld [vmem:[%s1477_s2 + $0x90] sm:$0xff]  ;;  %v109_v31 = vld [vmem:[%s1477_s2 + $0x98] sm:$0xff] }
   0x8   :  { %1110 = vmatpush3.bf16.msra.mxu0 %v1109_v7  ;;  %v1130_v29 = vpack.c.bf16 %v107_v28, %v106_v27  ;;  %v1133_v32 = vpack.c.bf16 %v109_v31, %v108_v30  ;;  %v110_v33 = vld [vmem:[%s1477_s2 + $0xa0] sm:$0xff]  ;;  %v111_v34 = vld [vmem:[%s1477_s2 + $0xa8] sm:$0xff]  ;;  %v112_v36 = vld [vmem:[%s1477_s2 + $0xb0] sm:$0xff] }
   0x9   :  { %1111 = vmatprep.subr.bf16.mxu0 %v1207_v0  ;;  %1125 = vmatpush3.bf16.msra.mxu1 %v1124_v24  ;;  %v1136_v35 = vpack.c.bf16 %v111_v34, %v110_v33  ;;  %v113_v37 = vld [vmem:[%s1477_s2 + $0xb8] sm:$0xff]  ;;  %v201_v38 = vld [vmem:[%s1477_s2 + $0xc0] sm:$0xff]  ;;  %v202_v40 = vld [vmem:[%s1477_s2 + $0xc8] sm:$0xff] }
   0xa   :  { %1126 = vmatprep.subr.bf16.mxu1 %v1207_v0  ;;  %v1139_v39 = vpack.c.bf16 %v113_v37, %v112_v36  ;;  %v205_v41 = vld [vmem:[%s1477_s2 + $0xe0] sm:$0xff]  ;;  %v206_v42 = vld [vmem:[%s1477_s2 + $0xe8] sm:$0xff]  ;;  %v207_v44 = vld [vmem:[%s1477_s2 + $0xf0] sm:$0xff]  ;;  %v1148_v45 = vpack.c.bf16 %v202_v40, %v201_v38 }
   0xb   :  { %v1142_v43 = vpack.c.bf16 %v206_v42, %v205_v41  ;;  %v208_v46 = vld [vmem:[%s1477_s2 + $0xf8] sm:$0xff]  ;;  %v203_v48 = vld [vmem:[%s1477_s2 + $0xd0] sm:$0xff]  ;;  %v14_v54 = vld [vmem:[%s1479_s0] sm:$0xff] }
   0xc   :  { %1113 = vmatpush3.bf16.msra.mxu0 %v1112_v10  ;;  %v204_v49 = vld [vmem:[%s1477_s2 + $0xd8] sm:$0xff]  ;;  %v1145_v50 = vpack.c.bf16 %v208_v46, %v207_v44  ;;  %v369_v6 = vld [vmem:[%s1477_s2 + $0x108] sm:$0xff]  ;;  %v370_v7 = vld [vmem:[%s1477_s2 + $0x110] sm:$0xff] }
   0xd   :  { %1114 = vmatprep.subr.bf16.mxu0 %v1207_v0  ;;  %1128 = vmatpush3.bf16.msra.mxu1 %v1127_v26  ;;  %v1151_v53 = vpack.c.bf16 %v204_v49, %v203_v48  ;;  %v458_v8 = vld [vmem:[%s1477_s2 + $0x130] sm:$0xff]  ;;  %v1154_v9 = vpack.c.bf16 %v370_v7, %v369_v6  ;;  %v459_v10 = vld [vmem:[%s1477_s2 + $0x138] sm:$0xff]  ;;  %v460_v14 = vld [vmem:[%s1477_s2 + $0x140] sm:$0xff] }
   0xe   :  { %1129 = vmatprep.subr.bf16.mxu1 %v1207_v0  ;;  %v1160_v11 = vpack.c.bf16 %v459_v10, %v458_v8  ;;  %v371_v12 = vld [vmem:[%s1477_s2 + $0x118] sm:$0xff]  ;;  %v549_v30 = vld [vmem:[%s1477_s2 + $0x160] sm:$0xff]  ;;  %v551_v33 = vld [vmem:[%s1477_s2 + $0x170] sm:$0xff] }
   0xf   :  { %v553_v36 = vld [vmem:[%s1477_s2 + $0x180] sm:$0xff]  ;;  %v901_v38 = vld [vmem:[%s1477_s2 + $0x150] ss:$0 sm:$0xff]  ;;  %v647_v49 = vld [vmem:[%s1477_s2 + $0x198] sm:$0xff] }
  0x10   :  { %1116 = vmatpush3.bf16.msra.mxu0 %v1115_v13  ;;  %v372_v13 = vld [vmem:[%s1477_s2 + $0x120] sm:$0xff] }
  0x11   :  { %1117 = vmatprep.subr.bf16.mxu0 %v1207_v0  ;;  %1131 = vmatpush3.bf16.msra.mxu1 %v1130_v29  ;;  %v1157_v15 = vpack.c.bf16 %v372_v13, %v371_v12  ;;  %v548_v29 = vld [vmem:[%s1477_s2 + $0x158] sm:$0xff]  ;;  %v808_v13 = vld [vmem:[%s1477_s2 + $0x1b0] sm:$0xff] }
  0x12   :  { %1132 = vmatprep.subr.bf16.mxu1 %v1207_v0  ;;  %v1166_v31 = vpack.c.bf16 %v549_v30, %v548_v29 }
  0x14   :  { %1119 = vmatpush3.bf16.msra.mxu0 %v1118_v16  ;;  %v461_v16 = vld [vmem:[%s1477_s2 + $0x148] sm:$0xff] }
  0x15   :  { %1120 = vmatprep.subr.bf16.mxu0 %v1207_v0  ;;  %1134 = vmatpush3.bf16.msra.mxu1 %v1133_v32  ;;  %v1163_v17 = vpack.c.bf16 %v461_v16, %v460_v14  ;;  %v550_v32 = vld [vmem:[%s1477_s2 + $0x168] sm:$0xff]  ;;  %v809_v14 = vld [vmem:[%s1477_s2 + $0x1b8] sm:$0xff] }
  0x16   :  { %1135 = vmatprep.subr.bf16.mxu1 %v1207_v0  ;;  %v1169_v34 = vpack.c.bf16 %v551_v33, %v550_v32 }
  0x18   :  { %1122 = vmatpush3.bf16.msra.mxu0 %v1121_v19  ;;  %v898_v19 = vld [vmem:[%s1477_s2 + $0x100] ss:$0 sm:$0xff] }
  0x19   :  { %1141 = vmatprep.subr.bf16.mxu0 %v1207_v0  ;;  %1137 = vmatpush3.bf16.msra.mxu1 %v1136_v35  ;;  %v552_v35 = vld [vmem:[%s1477_s2 + $0x178] sm:$0xff] }
  0x1a   :  { %1138 = vmatprep.subr.bf16.mxu1 %v1207_v0  ;;  %v1172_v37 = vpack.c.bf16 %v553_v36, %v552_v35 }
  0x1b   :  { %996 = vmatmul.mubr.msk.f32.vlgmr.msra.gmra.mrb[0].mxu0 %vm28_vm1, %v15_v20 }
  0x1c   :  { %1033 = vmatprep.mubr.msk.f32.mxu0 %vm1208_vm0, %v1209_v4  ;;  %1143 = vmatpush3.bf16.msra.mxu0 %v1142_v43 }
  0x1d   :  { %1140 = vmatpush3.bf16.msra.mxu1 %v1139_v39  ;;  %1144 = vmatprep.subr.bf16.mxu0 %v1207_v0 }
  0x1e   :  { %1147 = vmatprep.subr.bf16.mxu1 %v1207_v0 }
  0x20   :  { %1023 = vmatmul.mubr.msk.f32.vlgmr.msra.gmra.mrb[0].mxu1 %vm28_vm1, %v15_v20  ;;  %1146 = vmatpush3.bf16.msra.mxu0 %v1145_v50  ;;  %v648_v50 = vld [vmem:[%s1477_s2 + $0x1a0] sm:$0xff] }
  0x21   :  { %1149 = vmatpush3.bf16.msra.mxu1 %v1148_v45  ;;  %1044 = vmatprep.mubr.msk.f32.mxu1 %vm1208_vm0, %v1209_v4 }
  0x22   :  { %1150 = vmatprep.subr.bf16.mxu1 %v1207_v0  ;;  %1153 = vmatprep.subr.bf16.mxu0 %v1207_v0 }
  0x25   :  { %1152 = vmatpush3.bf16.msra.mxu1 %v1151_v53 }
  0x26   :  { %1159 = vmatprep.subr.bf16.mxu1 %v1207_v0 }
  0x28   :  { %1045 = vmatmul.mubr.msk.f32.vlgmr.msra.gmra.mrb[2].mxu1 %vm209_vm2, %v14_v54 }
  0x29   :  { %1066 = vmatprep.mubr.msk.f32.mxu1 %vm1208_vm0, %v1209_v4  ;;  %1161 = vmatpush3.bf16.msra.mxu1 %v1160_v11 }
  0x2a   :  { %1162 = vmatprep.subr.bf16.mxu1 %v1207_v0 }
  0x2d   :  { %1164 = vmatpush3.bf16.msra.mxu1 %v1163_v17 }
  0x2e   :  { %1174 = vmatprep.subr.bf16.mxu1 %v1207_v0 }
  0xee   :  { %v98_v47 = vpop.f32.mrb[0].mxu0 }
  0xef   :  { %v184_v51 = vmul.f32 %v98_v47, %v98_v47  ;;  %v997_v52 = vpop.f32.mrb[1].mxu0 }
  0xf1   :  { %186 = vrot.lane.b32.xlu0 %v184_v51, %s1210_s22 }
  0xf3   :  { %v1372_v1 = vpop.f32.mrb[0].mxu1 }
  0xf4   :  { %v1024_v2 = vpop.f32.mrb[1].mxu1 }
  0xf5   :  { %190 = vrot.lane.b32.xlu0 %v184_v51, %s1211_s23  ;;  %v645_v2 = vld [vmem:[%s1477_s2 + $0x188] sm:$0xff] }
  0xfb   :  { %v352_v3 = vpop.f32.mrb[2].mxu1 }
  0xfc   :  { %v1046_v5 = vpop.f32.mrb[3].mxu1 }
 0x163   :  { %v187_v55 = vpop.permute.xlu0 %186 }
 0x164   :  { %v189_v56 = vadd.f32 %v187_v55, %v184_v51  ;;  %v1175_v51 = vpack.c.bf16 %v648_v50, %v647_v49  ;;  %v899_v55 = vld [vmem:[%s1477_s2 + $0x128] ss:$0 sm:$0xff] }
 0x167   :  { %v191_v57 = vpop.permute.xlu0 %190 }
 0x168   :  { %v193_v58 = vadd.f32 %v191_v57, %v189_v56 }
 0x16a   :  { %1191 = vrsqrt.f32 %v193_v58  ;;  %vm196_vm3 = vcmp.eq.f32.partialorder %v193_v58, inf  ;;  %v199_v61 = vand.u32 2147483648, %v193_v58  ;;  %vm198_vm4 = vcmp.eq.f32.partialorder %v193_v58, 0.0 }
 0x174   :  { %v1192_v59 = vpop.eup %1191 }
 0x175   :  { %v195_v60 = vmul.f32 %v1192_v59, %v193_v58 }
 0x177   :  { %v197_v62 = vsel %vm196_vm3, %v193_v58, %v195_v60 }
 0x178   :  { %v200_v63 = vsel %vm198_vm4, %v199_v61, %v197_v62 }
 0x179   :  { %1034 = vmatmul.mubr.msk.f32.vlgmr.msra.gmra.mrb[2].mxu0 %vm209_vm2, %v200_v63 }
 0x17a   :  { %1055 = vmatprep.mubr.msk.f32.mxu0 %vm1208_vm0, %v1209_v4  ;;  %1155 = vmatpush3.bf16.msra.mxu0 %v1154_v9 }
 0x17b   :  { %1156 = vmatprep.subr.bf16.mxu0 %v1207_v0 }
 0x17e   :  { %1158 = vmatpush3.bf16.msra.mxu0 %v1157_v15  ;;  %v1181_v15 = vpack.c.bf16 %v809_v14, %v808_v13 }
 0x17f   :  { %1165 = vmatprep.subr.bf16.mxu0 %v1207_v0 }
 0x24c   :  { %v279_v18 = vpop.f32.mrb[2].mxu0 }
 0x24d   :  { %v353_v20 = vadd.f32 %v352_v3, %v279_v18  ;;  %v1035_v21 = vpop.f32.mrb[3].mxu0  ;;  %v646_v3 = vld [vmem:[%s1477_s2 + $0x190] sm:$0xff] }
 0x24e   :  { %v1178_v8 = vpack.c.bf16 %v646_v3, %v645_v2 }
 0x24f   :  { %v361_v22 = vadd.f32 %v898_v19, %v353_v20 }
 0x251   :  { %v362_v23 = vsub.f32 0.0, %v361_v22 }
 0x253   :  { %v363_v24 = vmul.f32 1.442695, %v362_v23 }
 0x255   :  { %1193 = vpow2.f32 %v363_v24 }
 0x25f   :  { %v1194_v25 = vpop.eup %1193 }
 0x260   :  { %v365_v26 = vadd.f32 1.0, %v1194_v25 }
 0x262   :  { %1195 = vrcp.f32 %v365_v26 }
 0x26c   :  { %v1196_v27 = vpop.eup %1195 }
 0x26d   :  { %v368_v28 = vmul.f32 %v1196_v27, %v361_v22  ;;  %v907_v27 = vld [vmem:[%s1477_s2 + $0x1c0] ss:$0 sm:$0xff] }
 0x26f   :  { %1056 = vmatmul.mubr.msk.f32.vlgmr.msra.gmra.mrb[4].mxu0 %vm209_vm2, %v368_v28  ;;  %1067 = vmatmul.mubr.msk.f32.vlgmr.msra.gmra.mrb[4].mxu1 %vm209_vm2, %v368_v28 }
 0x270   :  { %1081 = vmatprep.mubr.msk.f32.mxu0 %vm1208_vm0, %v1209_v4  ;;  %1088 = vmatprep.mubr.msk.f32.mxu1 %vm1208_vm0, %v1209_v4 }
 0x271   :  { %1167 = vmatpush3.bf16.msra.mxu0 %v1166_v31  ;;  %1176 = vmatpush3.bf16.msra.mxu1 %v1175_v51 }
 0x272   :  { %1168 = vmatprep.subr.bf16.mxu0 %v1207_v0  ;;  %1177 = vmatprep.subr.bf16.mxu1 %v1207_v0 }
 0x275   :  { %1170 = vmatpush3.bf16.msra.mxu0 %v1169_v34 }
 0x276   :  { %1171 = vmatprep.subr.bf16.mxu0 %v1207_v0 }
 0x279   :  { %1173 = vmatpush3.bf16.msra.mxu0 %v1172_v37 }
 0x342   :  { %v447_v39 = vpop.f32.mrb[4].mxu0  ;;  %v533_v40 = vpop.f32.mrb[4].mxu1 }
 0x343   :  { %v534_v41 = vadd.f32 %v901_v38, %v533_v40  ;;  %v1057_v42 = vpop.f32.mrb[5].mxu0  ;;  %v1068_v43 = vpop.f32.mrb[5].mxu1  ;;  %v448_v56 = vadd.f32 %v899_v55, %v447_v39 }
 0x345   :  { %538 = vrot.lane.b32.xlu1 %v534_v41, %s1212_s29  ;;  %v451_v57 = vsub.f32 0.0, %v448_v56 }
 0x347   :  { %v452_v58 = vmul.f32 1.442695, %v451_v57 }
 0x349   :  { %541 = vrot.lane.b32.xlu1 %v534_v41, %s1213_s30  ;;  %1197 = vpow2.f32 %v452_v58 }
 0x353   :  { %v1198_v61 = vpop.eup %1197 }
 0x3b7   :  { %v539_v44 = vpop.permute.xlu1 %538 }
 0x3b8   :  { %v545_v45 = vsel %vm544_vm5, %v534_v41, %v539_v44 }
 0x3bb   :  { %v542_v46 = vpop.permute.xlu1 %541 }
 0x3bc   :  { %v546_v47 = vsel %vm209_vm2, %v545_v45, %v542_v46 }
 0x3bd   :  { %v547_v48 = vmul.f32 %v546_v47, %v1372_v1  ;;  %v454_v1 = vadd.f32 1.0, %v1198_v61 }
 0x3bf   :  { %1082 = vmatmul.mubr.msk.f32.vlgmr.msra.gmra.mrb[6].mxu0 %vm554_vm6, %v547_v48 }
 0x492   :  { %v624_v52 = vpop.f32.mrb[6].mxu0 }
 0x493   :  { %v628_v53 = vmul.f32 %v624_v52, %v624_v52  ;;  %v1083_v54 = vpop.f32.mrb[7].mxu0 }
 0x495   :  { %634 = vrot.lane.b32.xlu1 %v628_v53, %s1210_s22  ;;  %630 = vrot.lane.b32.xlu0 %v628_v53, %s1214_s8 }
 0x507   :  { %v631_v59 = vpop.permute.xlu0 %630  ;;  %v635_v62 = vpop.permute.xlu1 %634 }
 0x508   :  { %v633_v60 = vadd.f32 %v631_v59, %v628_v53 }
 0x50a   :  { %v637_v63 = vadd.f32 %v635_v62, %v633_v60 }
 0x50c   :  { %1199 = vrsqrt.f32 %v637_v63  ;;  %vm640_vm7 = vcmp.eq.f32.partialorder %v637_v63, inf  ;;  %v643_v7 = vand.u32 2147483648, %v637_v63  ;;  %vm642_vm8 = vcmp.eq.f32.partialorder %v637_v63, 0.0 }
 0x50d   :  { %1201 = vrcp.f32 %v454_v1 }
 0x516   :  { %v1200_v5 = vpop.eup %1199 }
 0x517   :  { %v639_v6 = vmul.f32 %v1200_v5, %v637_v63  ;;  %v1202_v10 = vpop.eup %1201 }
 0x518   :  { %v457_v12 = vmul.f32 %v1202_v10, %v448_v56 }
 0x519   :  { %v641_v9 = vsel %vm640_vm7, %v637_v63, %v639_v6 }
 0x51a   :  { %v644_v11 = vsel %vm642_vm8, %v643_v7, %v641_v9 }
 0x51b   :  { %1089 = vmatmul.mubr.msk.f32.vlgmr.msra.gmra.mrb[6].mxu1 %vm544_vm5, %v644_v11 }
 0x51c   :  { %1179 = vmatpush3.bf16.msra.mxu1 %v1178_v8  ;;  %1095 = vmatprep.mubr.msk.f32.mxu1 %vm1208_vm0, %v1209_v4 }
 0x51d   :  { %1180 = vmatprep.subr.bf16.mxu1 %v1207_v0  ;;  %v906_v0 = vld [vmem:[%s1477_s2 + $0x1a8] ss:$0 sm:$0xff] }
 0x51f   :  { %1096 = vmatmul.mubr.msk.f32.vlgmr.msra.gmra.mrb[8].mxu1 %vm544_vm5, %v457_v12 }
 0x520   :  { %1102 = vmatprep.mubr.msk.f32.mxu1 %vm1208_vm0, %v1209_v4  ;;  %1182 = vmatpush3.bf16.msra.mxu1 %v1181_v15 }
 0x5ee   :  { %v718_v16 = vpop.f32.mrb[6].mxu1 }
 0x5ef   :  { %v1090_v17 = vpop.f32.mrb[7].mxu1 }
 0x5f2   :  { %v791_v18 = vpop.f32.mrb[8].mxu1 }
 0x5f3   :  { %v792_v19 = vadd.f32 %v791_v18, %v718_v16  ;;  %v1097_v20 = vpop.f32.mrb[9].mxu1 }
 0x5f5   :  { %v800_v4 = vadd.f32 %v906_v0, %v792_v19 }
 0x5f7   :  { %v801_v21 = vsub.f32 0.0, %v800_v4 }
 0x5f9   :  { %v802_v22 = vmul.f32 1.442695, %v801_v21 }
 0x5fb   :  { %1203 = vpow2.f32 %v802_v22 }
 0x605   :  { %v1204_v23 = vpop.eup %1203 }
 0x606   :  { %v804_v24 = vadd.f32 1.0, %v1204_v23 }
 0x608   :  { %1205 = vrcp.f32 %v804_v24 }
 0x612   :  { %v1206_v25 = vpop.eup %1205 }
 0x613   :  { %v807_v26 = vmul.f32 %v1206_v25, %v800_v4 }
 0x615   :  { %1103 = vmatmul.mubr.msk.f32.vlgmr.msra.gmra.mrb[10].mxu1 %vm544_vm5, %v807_v26 }
 0x6e8   :  { %v884_v28 = vpop.f32.mrb[10].mxu1 }
 0x6e9   :  { %v885_v29 = vadd.f32 %v907_v27, %v884_v28  ;;  %v1104_v30 = vpop.f32.mrb[11].mxu1 }
 0x6eb   :  { %889 = vst.msk [vmem:[%s1480_s3] sm:$0xff] %vm888_vm9, %v885_v29 }

</bundles_post_ra>
